<compile_context>
chip_gen: v6e
topology: v6e:2x2x1
jax: 0.10.0
libtpu: 0.0.40
codegen_flags: <defaults>
</compile_context>

<pallas_src>
import jax
import jax.numpy as jnp
from jax.experimental import pallas as pl
from jax.experimental.pallas import tpu as pltpu

HIDDEN = 64   # logical hidden width of the PyTorch module
LANE = 128    # padded hidden width: full vreg-lane / MXU-N utilization


def mlp_kernel(x_ref, w1_ref, b1_ref, w2_ref, b2_ref, w3_ref, b3_ref, o_ref):
    # Layer 1: Linear(in, 128pad) + ReLU. Operand dtype follows w1 (f32 unless
    # the caller supplied bf16 activations); f32 accumulation on the MXU.
    x = x_ref[...].astype(w1_ref.dtype)
    h1 = jnp.dot(x, w1_ref[...], preferred_element_type=jnp.float32) + b1_ref[...]
    h1 = jnp.maximum(h1, 0.0)
    # Layers 2/3 run at compute_dtype (bf16 default) with f32 accumulation.
    cd = w2_ref.dtype
    h2 = jnp.dot(h1.astype(cd), w2_ref[...], preferred_element_type=jnp.float32) + b2_ref[...]
    h2 = jnp.maximum(h2, 0.0)
    out = jnp.dot(h2.astype(cd), w3_ref[...], preferred_element_type=jnp.float32) + b3_ref[...]
    o_ref[...] = out.astype(o_ref.dtype)


def _physical_vmem_bytes():
    try:
        return int(pltpu.get_tpu_info().vmem_capacity_bytes)
    except Exception:
        return 64 * 1024 * 1024   # conservative fallback: assume v7x-sized VMEM


def feedforward_nn(x, params, *, block_rows=4096, compute_dtype=jnp.bfloat16):
    """x: (B, in_dim) f32 or bf16. params: w1,b1,w2,b2,w3,b3 in (fan_in, fan_out) layout."""
    B, in_dim = x.shape
    out_dim = params["w3"].shape[1]
    pad_h = LANE - HIDDEN

    # Layer-1 operand dtype: keep f32 unless the input is already bf16 (the K=32
    # first matmul is negligible; this keeps full input precision for free).
    l1_dtype = compute_dtype if x.dtype == jnp.bfloat16 else jnp.float32

    # Pad the hidden dim to a full 128-lane width (zero pad + ReLU(0)=0 keeps the
    # math identical). Biases stay f32 (epilogue add/ReLU are f32 on all chips).
    w1 = jnp.pad(params["w1"], ((0, 0), (0, pad_h))).astype(l1_dtype)
    b1 = jnp.pad(params["b1"], ((0, 0), (0, pad_h))).astype(jnp.float32)
    w2 = jnp.pad(params["w2"], ((0, pad_h), (0, pad_h))).astype(compute_dtype)
    b2 = jnp.pad(params["b2"], ((0, 0), (0, pad_h))).astype(jnp.float32)
    w3 = jnp.pad(params["w3"], ((0, pad_h), (0, 0))).astype(compute_dtype)
    b3 = params["b3"].astype(jnp.float32)

    # Per-generation VMEM budget / tile cap (see header). ~3 KiB VMEM per row:
    # tb<=16384 stays under ~48 MiB, tb<=8192 under ~24 MiB.
    phys_vmem = _physical_vmem_bytes()
    if phys_vmem >= 128 * 1024 * 1024:           # v5e / v6e
        vmem_limit, tb_cap = 96 * 1024 * 1024, 16384
    else:                                        # v7x (64 MiB per TensorCore)
        vmem_limit, tb_cap = 48 * 1024 * 1024, 8192

    # Keep >=2 grid steps whenever B allows it so the "parallel" batch axis can
    # be sharded across both v7x TensorCores; tile rounded to 8 sublanes.
    half_b = ((B + 1) // 2 + 7) // 8 * 8
    tb = min(int(block_rows), tb_cap, half_b)
    tb = max(8, (tb // 8) * 8)
    num_tiles = pl.cdiv(B, tb)   # last tile may overrun B; Pallas clamps edge DMAs

    bytes_accessed = (
        B * in_dim * x.dtype.itemsize
        + sum(a.size * a.dtype.itemsize for a in (w1, b1, w2, b2, w3, b3))
        + B * out_dim * 4
    )
    cost = pl.CostEstimate(
        flops=2 * B * (in_dim * LANE + LANE * LANE + LANE * out_dim),
        transcendentals=0,
        bytes_accessed=bytes_accessed,
    )

    def launch(single_buffer_weights):
        def wspec(shape):
            # Constant index_map -> block stays VMEM-resident across the grid;
            # single-buffer it so there is no second copy / pipeline bookkeeping.
            if single_buffer_weights:
                return pl.BlockSpec(shape, lambda i: (0, 0),
                                    pipeline_mode=pl.Buffered(1))
            return pl.BlockSpec(shape, lambda i: (0, 0))

        return pl.pallas_call(
            mlp_kernel,
            out_shape=jax.ShapeDtypeStruct((B, out_dim), jnp.float32),
            grid=(num_tiles,),
            in_specs=[
                pl.BlockSpec((tb, in_dim), lambda i: (i, 0)),
                wspec(w1.shape), wspec(b1.shape),
                wspec(w2.shape), wspec(b2.shape),
                wspec(w3.shape), wspec(b3.shape),
            ],
            out_specs=pl.BlockSpec((tb, out_dim), lambda i: (i, 0)),
            compiler_params=pltpu.CompilerParams(
                dimension_semantics=("parallel",),  # v7x: shard batch tiles across both TCs
                vmem_limit_bytes=vmem_limit,
            ),
            cost_estimate=cost,
        )(x, w1, b1, w2, b2, w3, b3)

    if hasattr(pl, "Buffered"):
        try:
            return launch(True)
        except Exception:
            pass   # pipeline_mode=pl.Buffered(1) unsupported in this build; use defaults
    return launch(False)


def init_params(key, in_dim, out_dim):
    """Deterministic init mimicking PyTorch nn.Linear (uniform +-1/sqrt(fan_in)).
    Weights stored as (fan_in, fan_out); biases as (1, fan_out) for 2D TPU layout."""
    def linear(k, fan_in, fan_out):
        kw, kb = jax.random.split(k)
        bound = 1.0 / jnp.sqrt(fan_in)
        w = jax.random.uniform(kw, (fan_in, fan_out), jnp.float32, -bound, bound)
        b = jax.random.uniform(kb, (1, fan_out), jnp.float32, -bound, bound)
        return w, b

    k1, k2, k3 = jax.random.split(key, 3)
    w1, b1 = linear(k1, in_dim, HIDDEN)
    w2, b2 = linear(k2, HIDDEN, HIDDEN)
    w3, b3 = linear(k3, HIDDEN, out_dim)
    return {"w1": w1, "b1": b1, "w2": w2, "b2": b2, "w3": w3, "b3": b3}


def reference(x, p):
    h1 = jnp.maximum(x @ p["w1"] + p["b1"], 0.0)
    h2 = jnp.maximum(h1 @ p["w2"] + p["b2"], 0.0)
    return h2 @ p["w3"] + p["b3"]


if __name__ == "__main__":
    key = jax.random.PRNGKey(0)
    k_x, k_p, k_x2 = jax.random.split(key, 3)

    in_dim, out_dim = 32, 8
    params = init_params(k_p, in_dim, out_dim)

    # Case 1: small batch, single tile, default path (f32 layer-1, bf16 layers 2/3).
    x = jax.random.normal(k_x, (8, in_dim), jnp.float32)
    out = jax.block_until_ready(feedforward_nn(x, params))
    ref = reference(x, params)
    assert out.shape == (8, out_dim), out.shape
    assert jnp.allclose(out, ref, atol=2e-2, rtol=2e-2), "bf16 mismatch vs reference"

    # Case 2: ragged batch (B=20, tb=8 -> 3 grid steps, last one partial) with
    # f32 operands everywhere: verifies the exact path and the clamped edge tile
    # (no wrapper-side padding of x anymore).
    x2 = jax.random.normal(k_x2, (20, in_dim), jnp.float32)
    out2 = jax.block_until_ready(
        feedforward_nn(x2, params, block_rows=8, compute_dtype=jnp.float32))
    ref2 = reference(x2, params)
    assert out2.shape == (20, out_dim), out2.shape
    assert jnp.allclose(out2, ref2, atol=1e-5, rtol=1e-5), "f32 mismatch vs reference"

    # Case 3: bf16 activations supplied at the API boundary (upstream producer is
    # bf16) -> the dominant x DMA is half-width.
    x3 = x.astype(jnp.bfloat16)
    out3 = jax.block_until_ready(feedforward_nn(x3, params))
    ref3 = reference(x3.astype(jnp.float32), params)
    assert out3.shape == (8, out_dim), out3.shape
    assert jnp.allclose(out3, ref3, atol=5e-2, rtol=5e-2), "bf16-x mismatch vs reference"

    print("KERNEL_OK")
</pallas_src>

<mosaic_0001>
module attributes {stable_mosaic.version = 11 : i64} {
  func.func @mlp_kernel(%arg0: i32, %arg1: memref<8x32xf32, #tpu.memory_space<vmem>>, %arg2: memref<32x128xf32, #tpu.memory_space<vmem>>, %arg3: memref<1x128xf32, #tpu.memory_space<vmem>>, %arg4: memref<128x128xbf16, #tpu.memory_space<vmem>>, %arg5: memref<1x128xf32, #tpu.memory_space<vmem>>, %arg6: memref<128x8xbf16, #tpu.memory_space<vmem>>, %arg7: memref<1x8xf32, #tpu.memory_space<vmem>>, %arg8: memref<8x8xf32, #tpu.memory_space<vmem>>) attributes {dimension_semantics = [#tpu.dimension_semantics<parallel>], iteration_bounds = array<i64: 1>, scalar_prefetch = 0 : i64, scratch_operands = 0 : i64, tpu.core_type = #tpu.core_type<tc>, window_params = [{transform_indices = @transform_0, window_bounds = array<i64: 8, 32>}, {pipeline_mode = #tpu.pipeline_mode<synchronous>, transform_indices = @transform_1, window_bounds = array<i64: 32, 128>}, {pipeline_mode = #tpu.pipeline_mode<synchronous>, transform_indices = @transform_2, window_bounds = array<i64: 1, 128>}, {pipeline_mode = #tpu.pipeline_mode<synchronous>, transform_indices = @transform_3, window_bounds = array<i64: 128, 128>}, {pipeline_mode = #tpu.pipeline_mode<synchronous>, transform_indices = @transform_4, window_bounds = array<i64: 1, 128>}, {pipeline_mode = #tpu.pipeline_mode<synchronous>, transform_indices = @transform_5, window_bounds = array<i64: 128, 8>}, {pipeline_mode = #tpu.pipeline_mode<synchronous>, transform_indices = @transform_6, window_bounds = array<i64: 1, 8>}, {transform_indices = @transform_7, window_bounds = array<i64: 8, 8>}]} {
    %c0 = arith.constant 0 : index
    %c0_0 = arith.constant 0 : index
    %0 = vector.load %arg1[%c0, %c0_0] : memref<8x32xf32, #tpu.memory_space<vmem>>, vector<8x32xf32>
    %c0_1 = arith.constant 0 : index
    %c0_2 = arith.constant 0 : index
    %1 = vector.load %arg2[%c0_1, %c0_2] : memref<32x128xf32, #tpu.memory_space<vmem>>, vector<32x128xf32>
    %cst = arith.constant dense<0.000000e+00> : vector<8x128xf32>
    %2 = tpu.matmul %0, %1, %cst {dimension_numbers = #tpu.dot_dimension_numbers<[1], [0], [0], [1], [0, 0, 1, 1], [], []>} : vector<8x32xf32>, vector<32x128xf32>, vector<8x128xf32> -> vector<8x128xf32>
    %c0_3 = arith.constant 0 : index
    %c0_4 = arith.constant 0 : index
    %3 = vector.load %arg3[%c0_3, %c0_4] : memref<1x128xf32, #tpu.memory_space<vmem>>, vector<1x128xf32>
    %4 = vector.broadcast %3 : vector<1x128xf32> to vector<8x128xf32>
    %5 = arith.addf %2, %4 : vector<8x128xf32>
    %cst_5 = arith.constant 0.000000e+00 : f32
    %6 = vector.broadcast %cst_5 : f32 to vector<8x128xf32>
    %7 = arith.maximumf %5, %6 : vector<8x128xf32>
    %8 = arith.truncf %7 : vector<8x128xf32> to vector<8x128xbf16>
    %c0_6 = arith.constant 0 : index
    %c0_7 = arith.constant 0 : index
    %9 = vector.load %arg4[%c0_6, %c0_7] : memref<128x128xbf16, #tpu.memory_space<vmem>>, vector<128x128xbf16>
    %cst_8 = arith.constant dense<0.000000e+00> : vector<8x128xf32>
    %10 = tpu.matmul %8, %9, %cst_8 {dimension_numbers = #tpu.dot_dimension_numbers<[1], [0], [0], [1], [0, 0, 1, 1], [], []>} : vector<8x128xbf16>, vector<128x128xbf16>, vector<8x128xf32> -> vector<8x128xf32>
    %c0_9 = arith.constant 0 : index
    %c0_10 = arith.constant 0 : index
    %11 = vector.load %arg5[%c0_9, %c0_10] : memref<1x128xf32, #tpu.memory_space<vmem>>, vector<1x128xf32>
    %12 = vector.broadcast %11 : vector<1x128xf32> to vector<8x128xf32>
    %13 = arith.addf %10, %12 : vector<8x128xf32>
    %cst_11 = arith.constant 0.000000e+00 : f32
    %14 = vector.broadcast %cst_11 : f32 to vector<8x128xf32>
    %15 = arith.maximumf %13, %14 : vector<8x128xf32>
    %16 = arith.truncf %15 : vector<8x128xf32> to vector<8x128xbf16>
    %c0_12 = arith.constant 0 : index
    %c0_13 = arith.constant 0 : index
    %17 = vector.load %arg6[%c0_12, %c0_13] : memref<128x8xbf16, #tpu.memory_space<vmem>>, vector<128x8xbf16>
    %cst_14 = arith.constant dense<0.000000e+00> : vector<8x8xf32>
    %18 = tpu.matmul %16, %17, %cst_14 {dimension_numbers = #tpu.dot_dimension_numbers<[1], [0], [0], [1], [0, 0, 1, 1], [], []>} : vector<8x128xbf16>, vector<128x8xbf16>, vector<8x8xf32> -> vector<8x8xf32>
    %c0_15 = arith.constant 0 : index
    %c0_16 = arith.constant 0 : index
    %19 = vector.load %arg7[%c0_15, %c0_16] : memref<1x8xf32, #tpu.memory_space<vmem>>, vector<1x8xf32>
    %20 = vector.broadcast %19 : vector<1x8xf32> to vector<8x8xf32>
    %21 = arith.addf %18, %20 : vector<8x8xf32>
    %c0_17 = arith.constant 0 : index
    %c0_18 = arith.constant 0 : index
    %22 = vector.load %arg8[%c0_17, %c0_18] : memref<8x8xf32, #tpu.memory_space<vmem>>, vector<8x8xf32>
    tpu.vector_store %arg8[%c0_17, %c0_18], %21 {strides = array<i32>} : memref<8x8xf32, #tpu.memory_space<vmem>>, vector<8x8xf32>,
    return
  }
  func.func @transform_0(%arg0: i32) -> (i32, i32) {
    %c0_i32 = arith.constant 0 : i32
    %c0_i32_0 = arith.constant 0 : i32
    return %arg0, %c0_i32 : i32, i32
  }
  func.func @transform_1(%arg0: i32) -> (i32, i32) {
    %c0_i32 = arith.constant 0 : i32
    %c0_i32_0 = arith.constant 0 : i32
    %c0_i32_1 = arith.constant 0 : i32
    return %c0_i32, %c0_i32_0 : i32, i32
  }
  func.func @transform_2(%arg0: i32) -> (i32, i32) {
    %c0_i32 = arith.constant 0 : i32
    %c0_i32_0 = arith.constant 0 : i32
    %c0_i32_1 = arith.constant 0 : i32
    return %c0_i32, %c0_i32_0 : i32, i32
  }
  func.func @transform_3(%arg0: i32) -> (i32, i32) {
    %c0_i32 = arith.constant 0 : i32
    %c0_i32_0 = arith.constant 0 : i32
    %c0_i32_1 = arith.constant 0 : i32
    return %c0_i32, %c0_i32_0 : i32, i32
  }
  func.func @transform_4(%arg0: i32) -> (i32, i32) {
    %c0_i32 = arith.constant 0 : i32
    %c0_i32_0 = arith.constant 0 : i32
    %c0_i32_1 = arith.constant 0 : i32
    return %c0_i32, %c0_i32_0 : i32, i32
  }
  func.func @transform_5(%arg0: i32) -> (i32, i32) {
    %c0_i32 = arith.constant 0 : i32
    %c0_i32_0 = arith.constant 0 : i32
    %c0_i32_1 = arith.constant 0 : i32
    return %c0_i32, %c0_i32_0 : i32, i32
  }
  func.func @transform_6(%arg0: i32) -> (i32, i32) {
    %c0_i32 = arith.constant 0 : i32
    %c0_i32_0 = arith.constant 0 : i32
    %c0_i32_1 = arith.constant 0 : i32
    return %c0_i32, %c0_i32_0 : i32, i32
  }
  func.func @transform_7(%arg0: i32) -> (i32, i32) {
    %c0_i32 = arith.constant 0 : i32
    %c0_i32_0 = arith.constant 0 : i32
    return %arg0, %c0_i32 : i32, i32
  }
}

module attributes {stable_mosaic.version = 11 : i64} {
  func.func @mlp_kernel(%arg0: i32, %arg1: memref<8x32xf32, #tpu.memory_space<vmem>>, %arg2: memref<32x128xf32, #tpu.memory_space<vmem>>, %arg3: memref<1x128xf32, #tpu.memory_space<vmem>>, %arg4: memref<128x128xbf16, #tpu.memory_space<vmem>>, %arg5: memref<1x128xf32, #tpu.memory_space<vmem>>, %arg6: memref<128x8xbf16, #tpu.memory_space<vmem>>, %arg7: memref<1x8xf32, #tpu.memory_space<vmem>>, %arg8: memref<8x8xf32, #tpu.memory_space<vmem>>) attributes {dimension_semantics = [#tpu.dimension_semantics<parallel>], iteration_bounds = array<i64: 1>, scalar_prefetch = 0 : i64, scratch_operands = 0 : i64, tpu.core_type = #tpu.core_type<tc>, window_params = [{transform_indices = @transform_0, window_bounds = array<i64: 8, 32>}, {pipeline_mode = #tpu.pipeline_mode<synchronous>, transform_indices = @transform_1, window_bounds = array<i64: 32, 128>}, {pipeline_mode = #tpu.pipeline_mode<synchronous>, transform_indices = @transform_2, window_bounds = array<i64: 1, 128>}, {pipeline_mode = #tpu.pipeline_mode<synchronous>, transform_indices = @transform_3, window_bounds = array<i64: 128, 128>}, {pipeline_mode = #tpu.pipeline_mode<synchronous>, transform_indices = @transform_4, window_bounds = array<i64: 1, 128>}, {pipeline_mode = #tpu.pipeline_mode<synchronous>, transform_indices = @transform_5, window_bounds = array<i64: 128, 8>}, {pipeline_mode = #tpu.pipeline_mode<synchronous>, transform_indices = @transform_6, window_bounds = array<i64: 1, 8>}, {transform_indices = @transform_7, window_bounds = array<i64: 8, 8>}]} {
    %c0 = arith.constant 0 : index
    %c0_0 = arith.constant 0 : index
    %0 = vector.load %arg1[%c0, %c0_0] : memref<8x32xf32, #tpu.memory_space<vmem>>, vector<8x32xf32>
    %c0_1 = arith.constant 0 : index
    %c0_2 = arith.constant 0 : index
    %1 = vector.load %arg2[%c0_1, %c0_2] : memref<32x128xf32, #tpu.memory_space<vmem>>, vector<32x128xf32>
    %cst = arith.constant dense<0.000000e+00> : vector<8x128xf32>
    %2 = tpu.matmul %0, %1, %cst {dimension_numbers = #tpu.dot_dimension_numbers<[1], [0], [0], [1], [0, 0, 1, 1], [], []>} : vector<8x32xf32>, vector<32x128xf32>, vector<8x128xf32> -> vector<8x128xf32>
    %c0_3 = arith.constant 0 : index
    %c0_4 = arith.constant 0 : index
    %3 = vector.load %arg3[%c0_3, %c0_4] : memref<1x128xf32, #tpu.memory_space<vmem>>, vector<1x128xf32>
    %4 = vector.broadcast %3 : vector<1x128xf32> to vector<8x128xf32>
    %5 = arith.addf %2, %4 : vector<8x128xf32>
    %cst_5 = arith.constant 0.000000e+00 : f32
    %6 = vector.broadcast %cst_5 : f32 to vector<8x128xf32>
    %7 = arith.maximumf %5, %6 : vector<8x128xf32>
    %8 = arith.truncf %7 : vector<8x128xf32> to vector<8x128xbf16>
    %c0_6 = arith.constant 0 : index
    %c0_7 = arith.constant 0 : index
    %9 = vector.load %arg4[%c0_6, %c0_7] : memref<128x128xbf16, #tpu.memory_space<vmem>>, vector<128x128xbf16>
    %cst_8 = arith.constant dense<0.000000e+00> : vector<8x128xf32>
    %10 = tpu.matmul %8, %9, %cst_8 {dimension_numbers = #tpu.dot_dimension_numbers<[1], [0], [0], [1], [0, 0, 1, 1], [], []>} : vector<8x128xbf16>, vector<128x128xbf16>, vector<8x128xf32> -> vector<8x128xf32>
    %c0_9 = arith.constant 0 : index
    %c0_10 = arith.constant 0 : index
    %11 = vector.load %arg5[%c0_9, %c0_10] : memref<1x128xf32, #tpu.memory_space<vmem>>, vector<1x128xf32>
    %12 = vector.broadcast %11 : vector<1x128xf32> to vector<8x128xf32>
    %13 = arith.addf %10, %12 : vector<8x128xf32>
    %cst_11 = arith.constant 0.000000e+00 : f32
    %14 = vector.broadcast %cst_11 : f32 to vector<8x128xf32>
    %15 = arith.maximumf %13, %14 : vector<8x128xf32>
    %16 = arith.truncf %15 : vector<8x128xf32> to vector<8x128xbf16>
    %c0_12 = arith.constant 0 : index
    %c0_13 = arith.constant 0 : index
    %17 = vector.load %arg6[%c0_12, %c0_13] : memref<128x8xbf16, #tpu.memory_space<vmem>>, vector<128x8xbf16>
    %cst_14 = arith.constant dense<0.000000e+00> : vector<8x8xf32>
    %18 = tpu.matmul %16, %17, %cst_14 {dimension_numbers = #tpu.dot_dimension_numbers<[1], [0], [0], [1], [0, 0, 1, 1], [], []>} : vector<8x128xbf16>, vector<128x8xbf16>, vector<8x8xf32> -> vector<8x8xf32>
    %c0_15 = arith.constant 0 : index
    %c0_16 = arith.constant 0 : index
    %19 = vector.load %arg7[%c0_15, %c0_16] : memref<1x8xf32, #tpu.memory_space<vmem>>, vector<1x8xf32>
    %20 = vector.broadcast %19 : vector<1x8xf32> to vector<8x8xf32>
    %21 = arith.addf %18, %20 : vector<8x8xf32>
    %c0_17 = arith.constant 0 : index
    %c0_18 = arith.constant 0 : index
    %22 = vector.load %arg8[%c0_17, %c0_18] : memref<8x8xf32, #tpu.memory_space<vmem>>, vector<8x8xf32>
    tpu.vector_store %arg8[%c0_17, %c0_18], %21 {strides = array<i32>} : memref<8x8xf32, #tpu.memory_space<vmem>>, vector<8x8xf32>,
    return
  }
  func.func @transform_0(%arg0: i32) -> (i32, i32) {
    %c0_i32 = arith.constant 0 : i32
    %c0_i32_0 = arith.constant 0 : i32
    return %arg0, %c0_i32 : i32, i32
  }
  func.func @transform_1(%arg0: i32) -> (i32, i32) {
    %c0_i32 = arith.constant 0 : i32
    %c0_i32_0 = arith.constant 0 : i32
    %c0_i32_1 = arith.constant 0 : i32
    return %c0_i32, %c0_i32_0 : i32, i32
  }
  func.func @transform_2(%arg0: i32) -> (i32, i32) {
    %c0_i32 = arith.constant 0 : i32
    %c0_i32_0 = arith.constant 0 : i32
    %c0_i32_1 = arith.constant 0 : i32
    return %c0_i32, %c0_i32_0 : i32, i32
  }
  func.func @transform_3(%arg0: i32) -> (i32, i32) {
    %c0_i32 = arith.constant 0 : i32
    %c0_i32_0 = arith.constant 0 : i32
    %c0_i32_1 = arith.constant 0 : i32
    return %c0_i32, %c0_i32_0 : i32, i32
  }
  func.func @transform_4(%arg0: i32) -> (i32, i32) {
    %c0_i32 = arith.constant 0 : i32
    %c0_i32_0 = arith.constant 0 : i32
    %c0_i32_1 = arith.constant 0 : i32
    return %c0_i32, %c0_i32_0 : i32, i32
  }
  func.func @transform_5(%arg0: i32) -> (i32, i32) {
    %c0_i32 = arith.constant 0 : i32
    %c0_i32_0 = arith.constant 0 : i32
    %c0_i32_1 = arith.constant 0 : i32
    return %c0_i32, %c0_i32_0 : i32, i32
  }
  func.func @transform_6(%arg0: i32) -> (i32, i32) {
    %c0_i32 = arith.constant 0 : i32
    %c0_i32_0 = arith.constant 0 : i32
    %c0_i32_1 = arith.constant 0 : i32
    return %c0_i32, %c0_i32_0 : i32, i32
  }
  func.func @transform_7(%arg0: i32) -> (i32, i32) {
    %c0_i32 = arith.constant 0 : i32
    %c0_i32_0 = arith.constant 0 : i32
    return %arg0, %c0_i32 : i32, i32
  }
}

</mosaic_0001>

<bundles_post_ra>
// kernel: tpu_custom_call.1
= control target key start
LH: loop header
LB: loop body
LE: loop exit
PB: predicated region body
PF: predicated region fallthrough
CT: control target
= control target key end

     0   :  { %12 = vsyncpa [#allocation3], 0  ;;  %s706_s0 = inlined_call_operand.vmem [shape: f32[8,32], index: 0, kind: input, shape index: {}]   ;;  %s707_s1 = inlined_call_operand.hbm [shape: f32[32,128], index: 1, kind: input, shape index: {}]   ;;  %s708_s2 = inlined_call_operand.vmem [shape: f32[1,128], index: 2, kind: input, shape index: {}]   ;;  %s709_s3 = inlined_call_operand.vmem [shape: bf16[128,128], index: 3, kind: input, shape index: {}]   ;;  %s710_s4 = inlined_call_operand.hbm [shape: f32[1,128], index: 4, kind: input, shape index: {}]   ;;  %s711_s5 = inlined_call_operand.vmem [shape: bf16[128,8], index: 5, kind: input, shape index: {}]   ;;  %s712_s6 = inlined_call_operand.vmem [shape: f32[1,8], index: 6, kind: input, shape index: {}]   ;;  %s713_s7 = inlined_call_operand.hbm [shape: f32[8,8], index: 7, kind: output, shape index: {}]  }
   0x1   :  { %13 = vsyncpa [#allocation6], 0 }
   0x2   :  { %14 = vsyncpa [#allocation4], 0  ;;  %s567_s24 = smov [#allocation2]  }
   0x3   :  { %s22_s25 = sshll.u32 %s567_s24, 4  ;;  %s23_s25 = int_to_ptr.vmem [resolvable:$true] %s22_s25 }
   0x4   :  { %s509_s26 = scalar_lea.vmem %s23_s25, 512  ;;  %p514_p1 = scmp.lt.s32.totalorder %s23_s25, %s23_s25 }
   0x5   :  { %p510_p0 = scmp.ne.s32.totalorder %s23_s25, %s509_s26  ;;  %p515_p2 = scmp.lt.s32.totalorder %s509_s26, %s509_s26 }
   0x7   :  { %p516_p3 = por %p515_p2, %p514_p1 }
   0x9   :  { %p517_p4 = pnand %p516_p3, %p510_p0 }
   0xb   :  { %520 = shalt.err (!%p517_p4)
}
   0xc   :  { %s568_s27 = smov 128   ;;  %s569_s28 = smov 8  }
   0xd   :  { %28 = dma.hbm_to_vmem [thread:$0]  %s707_s1, 512, %s23_s25, [#allocation3], %s568_s27, %s568_s27, %s569_s28  }
   0xe   :  { %s570_s8 = smov [#allocation5]  }
   0xf   :  { %s39_s9 = sshll.u32 %s570_s8, 4  ;;  %s40_s9 = int_to_ptr.vmem [resolvable:$true] %s39_s9 }
  0x10   :  { %s529_s10 = scalar_lea.vmem %s40_s9, 16  ;;  %s533_s11 = scalar_lea.vmem %s40_s9, 32 }
  0x11   :  { %p530_p5 = scmp.ne.s32.totalorder %s40_s9, %s529_s10  ;;  %p534_p6 = scmp.lt.s32.totalorder %s40_s9, %s40_s9 }
  0x12   :  { %p535_p7 = scmp.lt.s32.totalorder %s533_s11, %s529_s10 }
  0x14   :  { %p536_p8 = por %p535_p7, %p534_p6 }
  0x16   :  { %p537_p9 = pnand %p536_p8, %p530_p5 }
  0x18   :  { %540 = shalt.err (!%p537_p9)
}
  0x19   :  { %42 = dma.hbm_to_vmem [thread:$0]  %s710_s4, 16, %s40_s9, [#allocation6]  }
  0x1a   :  { %561 = dma.done.wait [#allocation3], 512  }
  0x1b   :  { %562 = vsyncadd [#allocation3], 4294966784 }
  0x1c   :  { %563 = dma.done.wait [#allocation6], 16  }
  0x1d   :  { %564 = vsyncadd [#allocation6], 4294967280  ;;  %v571_v0 = vmov 0.0   ;;  %vm572_vm0 = vmmov 0   ;;  %v58_v1 = vld [vmem:[#allocation2 + $0x18] sm:$0xff]  ;;  %v57_v2 = vld [vmem:[#allocation2 + $0x10] sm:$0xff] }
  0x1e   :  { %427 = vmatprep.subr.mxu0 %v571_v0  ;;  %435 = vmatprep.mubr.msk.f32.mxu0 %vm572_vm0, %v571_v0  ;;  %v56_v3 = vld [vmem:[#allocation2 + $0x8] sm:$0xff]  ;;  %v485_v4 = vld [vmem:[%s709_s3 + $0x38] sm:$0xff]   ;;  %v55_v5 = vld [vmem:[#allocation2] sm:$0xff]  ;;  %vm66_vm1 = vcmask 261120   ;;  %vm366_vm2 = vcmask 64512  }
  0x1f   :  { %438 = vmatprep.subr.bf16.mxu1 %v571_v0  ;;  %454 = vmatprep.mubr.msk.bf16.mxu1 %vm572_vm0, %v571_v0  ;;  %v486_v6 = vld [vmem:[%s709_s3 + $0x30] sm:$0xff]   ;;  %v54_v7 = vld [vmem:[%s706_s0] sm:$0xff]  ;;  %v487_v8 = vld [vmem:[%s709_s3 + $0x28] sm:$0xff]   ;;  %s573_s0 = smov [#allocation7]  }
  0x20   :  { %428 = vmatpush3.msra.mxu0 %v58_v1  ;;  %439 = vmatpush3.bf16.msra.mxu1 %v485_v4  ;;  %v488_v9 = vld [vmem:[%s709_s3 + $0x20] sm:$0xff]   ;;  %v489_v10 = vld [vmem:[%s709_s3 + $0x18] sm:$0xff]   ;;  %v490_v11 = vld [vmem:[%s709_s3 + $0x10] sm:$0xff]   ;;  %s374_s22 = sshll.u32 %s573_s0, 4  ;;  %s375_s22 = int_to_ptr.vmem [resolvable:$true] %s374_s22 }
  0x21   :  { %429 = vmatprep.subr.mxu0 %v571_v0  ;;  %440 = vmatprep.subr.bf16.mxu1 %v571_v0  ;;  %v491_v12 = vld [vmem:[%s709_s3 + $0x8] sm:$0xff]   ;;  %v492_v13 = vld [vmem:[%s709_s3] sm:$0xff]   ;;  %v493_v14 = vld [vmem:[%s711_s5 + $0x38] sm:$0xff]   ;;  %p546_p11 = scmp.lt.s32.totalorder %s375_s22, %s375_s22 }
  0x22   :  { %430 = vmatpush3.msra.mxu0 %v57_v2  ;;  %v494_v15 = vld [vmem:[%s711_s5 + $0x30] sm:$0xff]   ;;  %v495_v16 = vld [vmem:[%s711_s5 + $0x28] sm:$0xff]   ;;  %v496_v17 = vld [vmem:[%s711_s5 + $0x20] sm:$0xff]  }
  0x23   :  { %431 = vmatprep.subr.mxu0 %v571_v0  ;;  %v497_v18 = vld [vmem:[%s711_s5 + $0x18] sm:$0xff]   ;;  %v498_v19 = vld [vmem:[%s711_s5 + $0x10] sm:$0xff]   ;;  %v384_v20 = vld [vmem:[%s708_s2] ss:$0 sm:$0xff] }
  0x24   :  { %432 = vmatpush3.msra.mxu0 %v56_v3  ;;  %441 = vmatpush3.bf16.msra.mxu1 %v486_v6  ;;  %v499_v26 = vld [vmem:[%s711_s5 + $0x8] sm:$0xff]   ;;  %v500_v27 = vld [vmem:[%s711_s5] sm:$0xff]   ;;  %s541_s5 = scalar_lea.vmem %s375_s22, 128 }
  0x25   :  { %433 = vmatprep.subr.mxu0 %v571_v0  ;;  %442 = vmatprep.subr.bf16.mxu1 %v571_v0  ;;  %v386_v28 = vld [vmem:[#allocation5] ss:$0 sm:$0xff]  ;;  %p542_p10 = scmp.ne.s32.totalorder %s375_s22, %s541_s5  ;;  %p547_p12 = scmp.lt.s32.totalorder %s541_s5, %s541_s5 }
  0x26   :  { %434 = vmatpush3.msra.mxu0 %v55_v5  ;;  %v395_v36 = vld [vmem:[%s712_s6] ss:$0 sm:$0xff] }
  0x27   :  { %436 = vmatmul.mubr.msk.f32.vlgmr.msra.gmra.mxu0 %vm66_vm1, %v54_v7  ;;  %458 = vmatprep.subr.bf16.mxu0 %v571_v0  ;;  %p548_p13 = por %p547_p12, %p546_p11 }
  0x28   :  { %474 = vmatprep.mubr.msk.bf16.mxu0 %vm572_vm0, %v571_v0  ;;  %443 = vmatpush3.bf16.msra.mxu1 %v487_v8 }
  0x29   :  { %444 = vmatprep.subr.bf16.mxu1 %v571_v0  ;;  %459 = vmatpush3.bf16.msra.mxu0 %v493_v14  ;;  %p549_p0 = pnand %p548_p13, %p542_p10 }
  0x2a   :  { %460 = vmatprep.subr.bf16.mxu0 %v571_v0 }
  0x2c   :  { %445 = vmatpush3.bf16.msra.mxu1 %v488_v9 }
  0x2d   :  { %446 = vmatprep.subr.bf16.mxu1 %v571_v0  ;;  %461 = vmatpush3.bf16.msra.mxu0 %v494_v15 }
  0x2e   :  { %462 = vmatprep.subr.bf16.mxu0 %v571_v0 }
  0x30   :  { %447 = vmatpush3.bf16.msra.mxu1 %v489_v10 }
  0x31   :  { %448 = vmatprep.subr.bf16.mxu1 %v571_v0  ;;  %463 = vmatpush3.bf16.msra.mxu0 %v495_v16 }
  0x32   :  { %464 = vmatprep.subr.bf16.mxu0 %v571_v0 }
  0x34   :  { %449 = vmatpush3.bf16.msra.mxu1 %v490_v11 }
  0x35   :  { %450 = vmatprep.subr.bf16.mxu1 %v571_v0  ;;  %465 = vmatpush3.bf16.msra.mxu0 %v496_v17 }
  0x36   :  { %466 = vmatprep.subr.bf16.mxu0 %v571_v0 }
  0x38   :  { %451 = vmatpush3.bf16.msra.mxu1 %v491_v12 }
  0x39   :  { %452 = vmatprep.subr.bf16.mxu1 %v571_v0  ;;  %467 = vmatpush3.bf16.msra.mxu0 %v497_v18 }
  0x3a   :  { %468 = vmatprep.subr.bf16.mxu0 %v571_v0 }
  0x3c   :  { %453 = vmatpush3.bf16.msra.mxu1 %v492_v13 }
  0x3d   :  { %469 = vmatpush3.bf16.msra.mxu0 %v498_v19 }
  0x3e   :  { %470 = vmatprep.subr.bf16.mxu0 %v571_v0 }
  0x41   :  { %471 = vmatpush3.bf16.msra.mxu0 %v499_v26 }
  0x42   :  { %472 = vmatprep.subr.bf16.mxu0 %v571_v0 }
  0x45   :  { %473 = vmatpush3.bf16.msra.mxu0 %v500_v27 }
  0xe7   :  { %v136_v21 = vpop.f32.mrf.mxu0 }
  0xe8   :  { %v137_v22 = vadd.f32 %v384_v20, %v136_v21 }
  0xe9   :  { %v437_v23 = vpop.f32.mrf.mxu0 }
  0xea   :  { %v140_v24 = vmax.f32 %v137_v22, 0.0 }
  0xec   :  { %v141_v25 = vpack.c.bf16 %v140_v24, %v140_v24 }
  0xee   :  { %455 = vmatmul.mubr.bf16.vlgmr.msra.gmra.mxu1 %v141_v25 }
 0x1ae   :  { %v247_v29 = vpop.f32.mrf.mxu1 }
 0x1af   :  { %v248_v30 = vadd.f32 %v386_v28, %v247_v29 }
 0x1b0   :  { %v456_v31 = vpop.f32.mrf.mxu1 }
 0x1b1   :  { %v253_v32 = vmax.f32 %v248_v30, 0.0 }
 0x1b2   :  { %v250_v33 = vpop.f32.mrf.mxu1 }
 0x1b3   :  { %v254_v34 = vpack.c.bf16 %v253_v32, %v253_v32 }
 0x1b4   :  { %v457_v35 = vpop.f32.mrf.mxu1 }
 0x1b5   :  { %475 = vmatmul.mubr.bf16.vlgmr.msra.gmra.mxu0 %v254_v34 }
 0x275   :  { %v360_v37 = vpop.f32.mrf.mxu0 }
 0x276   :  { %v361_v38 = vadd.f32 %v395_v36, %v360_v37 }
 0x277   :  { %v476_v39 = vpop.f32.mrf.mxu0 }
 0x278   :  { %367 = vst.msk [vmem:[#allocation7] sm:$0xff] %vm366_vm2, %v361_v38 }
 0x279   :  { %v363_v40 = vpop.f32.mrf.mxu0 }
 0x27a   :  { %552 = shalt.err (!%p549_p0)
}
 0x27b   :  { %377 = dma.vmem_to_hbm [thread:$0]  %s375_s22, 128, %s713_s7, [#allocation4]   ;;  %v477_v41 = vpop.f32.mrf.mxu0 }
 0x27c   :  { %565 = dma.done.wait [#allocation4], 128  }
 0x27d   :  { %566 = vsyncadd [#allocation4], 4294967168 }
 0x27e   :  { %381 = vsyncpa [#allocation3], 1 }
 0x27f   :  { %382 = vsyncpa [#allocation6], 1 }
 0x280   :  { %383 = vsyncpa [#allocation4], 1 }

// kernel: tpu_custom_call.1
= control target key start
LH: loop header
LB: loop body
LE: loop exit
PB: predicated region body
PF: predicated region fallthrough
CT: control target
= control target key end

     0   :  { %12 = vsyncpa [#allocation3], 0  ;;  %s706_s0 = inlined_call_operand.vmem [shape: f32[8,32], index: 0, kind: input, shape index: {}]   ;;  %s707_s1 = inlined_call_operand.hbm [shape: f32[32,128], index: 1, kind: input, shape index: {}]   ;;  %s708_s2 = inlined_call_operand.vmem [shape: f32[1,128], index: 2, kind: input, shape index: {}]   ;;  %s709_s3 = inlined_call_operand.vmem [shape: bf16[128,128], index: 3, kind: input, shape index: {}]   ;;  %s710_s4 = inlined_call_operand.hbm [shape: f32[1,128], index: 4, kind: input, shape index: {}]   ;;  %s711_s5 = inlined_call_operand.vmem [shape: bf16[128,8], index: 5, kind: input, shape index: {}]   ;;  %s712_s6 = inlined_call_operand.vmem [shape: f32[1,8], index: 6, kind: input, shape index: {}]   ;;  %s713_s7 = inlined_call_operand.hbm [shape: f32[8,8], index: 7, kind: output, shape index: {}]  }
   0x1   :  { %13 = vsyncpa [#allocation6], 0 }
   0x2   :  { %14 = vsyncpa [#allocation4], 0  ;;  %s567_s24 = smov [#allocation2]  }
   0x3   :  { %s22_s25 = sshll.u32 %s567_s24, 4  ;;  %s23_s25 = int_to_ptr.vmem [resolvable:$true] %s22_s25 }
   0x4   :  { %s509_s26 = scalar_lea.vmem %s23_s25, 512  ;;  %p514_p1 = scmp.lt.s32.totalorder %s23_s25, %s23_s25 }
   0x5   :  { %p510_p0 = scmp.ne.s32.totalorder %s23_s25, %s509_s26  ;;  %p515_p2 = scmp.lt.s32.totalorder %s509_s26, %s509_s26 }
   0x7   :  { %p516_p3 = por %p515_p2, %p514_p1 }
   0x9   :  { %p517_p4 = pnand %p516_p3, %p510_p0 }
   0xb   :  { %520 = shalt.err (!%p517_p4)
}
   0xc   :  { %s568_s27 = smov 128   ;;  %s569_s28 = smov 8  }
   0xd   :  { %28 = dma.hbm_to_vmem [thread:$0]  %s707_s1, 512, %s23_s25, [#allocation3], %s568_s27, %s568_s27, %s569_s28  }
   0xe   :  { %s570_s8 = smov [#allocation5]  }
   0xf   :  { %s39_s9 = sshll.u32 %s570_s8, 4  ;;  %s40_s9 = int_to_ptr.vmem [resolvable:$true] %s39_s9 }
  0x10   :  { %s529_s10 = scalar_lea.vmem %s40_s9, 16  ;;  %s533_s11 = scalar_lea.vmem %s40_s9, 32 }
  0x11   :  { %p530_p5 = scmp.ne.s32.totalorder %s40_s9, %s529_s10  ;;  %p534_p6 = scmp.lt.s32.totalorder %s40_s9, %s40_s9 }
  0x12   :  { %p535_p7 = scmp.lt.s32.totalorder %s533_s11, %s529_s10 }
  0x14   :  { %p536_p8 = por %p535_p7, %p534_p6 }
  0x16   :  { %p537_p9 = pnand %p536_p8, %p530_p5 }
  0x18   :  { %540 = shalt.err (!%p537_p9)
}
  0x19   :  { %42 = dma.hbm_to_vmem [thread:$0]  %s710_s4, 16, %s40_s9, [#allocation6]  }
  0x1a   :  { %561 = dma.done.wait [#allocation3], 512  }
  0x1b   :  { %562 = vsyncadd [#allocation3], 4294966784 }
  0x1c   :  { %563 = dma.done.wait [#allocation6], 16  }
  0x1d   :  { %564 = vsyncadd [#allocation6], 4294967280  ;;  %v571_v0 = vmov 0.0   ;;  %vm572_vm0 = vmmov 0   ;;  %v58_v1 = vld [vmem:[#allocation2 + $0x18] sm:$0xff]  ;;  %v57_v2 = vld [vmem:[#allocation2 + $0x10] sm:$0xff] }
  0x1e   :  { %427 = vmatprep.subr.mxu0 %v571_v0  ;;  %435 = vmatprep.mubr.msk.f32.mxu0 %vm572_vm0, %v571_v0  ;;  %v56_v3 = vld [vmem:[#allocation2 + $0x8] sm:$0xff]  ;;  %v485_v4 = vld [vmem:[%s709_s3 + $0x38] sm:$0xff]   ;;  %v55_v5 = vld [vmem:[#allocation2] sm:$0xff]  ;;  %vm66_vm1 = vcmask 261120   ;;  %vm366_vm2 = vcmask 64512  }
  0x1f   :  { %438 = vmatprep.subr.bf16.mxu1 %v571_v0  ;;  %454 = vmatprep.mubr.msk.bf16.mxu1 %vm572_vm0, %v571_v0  ;;  %v486_v6 = vld [vmem:[%s709_s3 + $0x30] sm:$0xff]   ;;  %v54_v7 = vld [vmem:[%s706_s0] sm:$0xff]  ;;  %v487_v8 = vld [vmem:[%s709_s3 + $0x28] sm:$0xff]   ;;  %s573_s0 = smov [#allocation7]  }
  0x20   :  { %428 = vmatpush3.msra.mxu0 %v58_v1  ;;  %439 = vmatpush3.bf16.msra.mxu1 %v485_v4  ;;  %v488_v9 = vld [vmem:[%s709_s3 + $0x20] sm:$0xff]   ;;  %v489_v10 = vld [vmem:[%s709_s3 + $0x18] sm:$0xff]   ;;  %v490_v11 = vld [vmem:[%s709_s3 + $0x10] sm:$0xff]   ;;  %s374_s22 = sshll.u32 %s573_s0, 4  ;;  %s375_s22 = int_to_ptr.vmem [resolvable:$true] %s374_s22 }
  0x21   :  { %429 = vmatprep.subr.mxu0 %v571_v0  ;;  %440 = vmatprep.subr.bf16.mxu1 %v571_v0  ;;  %v491_v12 = vld [vmem:[%s709_s3 + $0x8] sm:$0xff]   ;;  %v492_v13 = vld [vmem:[%s709_s3] sm:$0xff]   ;;  %v493_v14 = vld [vmem:[%s711_s5 + $0x38] sm:$0xff]   ;;  %p546_p11 = scmp.lt.s32.totalorder %s375_s22, %s375_s22 }
  0x22   :  { %430 = vmatpush3.msra.mxu0 %v57_v2  ;;  %v494_v15 = vld [vmem:[%s711_s5 + $0x30] sm:$0xff]   ;;  %v495_v16 = vld [vmem:[%s711_s5 + $0x28] sm:$0xff]   ;;  %v496_v17 = vld [vmem:[%s711_s5 + $0x20] sm:$0xff]  }
  0x23   :  { %431 = vmatprep.subr.mxu0 %v571_v0  ;;  %v497_v18 = vld [vmem:[%s711_s5 + $0x18] sm:$0xff]   ;;  %v498_v19 = vld [vmem:[%s711_s5 + $0x10] sm:$0xff]   ;;  %v384_v20 = vld [vmem:[%s708_s2] ss:$0 sm:$0xff] }
  0x24   :  { %432 = vmatpush3.msra.mxu0 %v56_v3  ;;  %441 = vmatpush3.bf16.msra.mxu1 %v486_v6  ;;  %v499_v26 = vld [vmem:[%s711_s5 + $0x8] sm:$0xff]   ;;  %v500_v27 = vld [vmem:[%s711_s5] sm:$0xff]   ;;  %s541_s5 = scalar_lea.vmem %s375_s22, 128 }
  0x25   :  { %433 = vmatprep.subr.mxu0 %v571_v0  ;;  %442 = vmatprep.subr.bf16.mxu1 %v571_v0  ;;  %v386_v28 = vld [vmem:[#allocation5] ss:$0 sm:$0xff]  ;;  %p542_p10 = scmp.ne.s32.totalorder %s375_s22, %s541_s5  ;;  %p547_p12 = scmp.lt.s32.totalorder %s541_s5, %s541_s5 }
  0x26   :  { %434 = vmatpush3.msra.mxu0 %v55_v5  ;;  %v395_v36 = vld [vmem:[%s712_s6] ss:$0 sm:$0xff] }
  0x27   :  { %436 = vmatmul.mubr.msk.f32.vlgmr.msra.gmra.mxu0 %vm66_vm1, %v54_v7  ;;  %458 = vmatprep.subr.bf16.mxu0 %v571_v0  ;;  %p548_p13 = por %p547_p12, %p546_p11 }
  0x28   :  { %474 = vmatprep.mubr.msk.bf16.mxu0 %vm572_vm0, %v571_v0  ;;  %443 = vmatpush3.bf16.msra.mxu1 %v487_v8 }
  0x29   :  { %444 = vmatprep.subr.bf16.mxu1 %v571_v0  ;;  %459 = vmatpush3.bf16.msra.mxu0 %v493_v14  ;;  %p549_p0 = pnand %p548_p13, %p542_p10 }
  0x2a   :  { %460 = vmatprep.subr.bf16.mxu0 %v571_v0 }
  0x2c   :  { %445 = vmatpush3.bf16.msra.mxu1 %v488_v9 }
  0x2d   :  { %446 = vmatprep.subr.bf16.mxu1 %v571_v0  ;;  %461 = vmatpush3.bf16.msra.mxu0 %v494_v15 }
  0x2e   :  { %462 = vmatprep.subr.bf16.mxu0 %v571_v0 }
  0x30   :  { %447 = vmatpush3.bf16.msra.mxu1 %v489_v10 }
  0x31   :  { %448 = vmatprep.subr.bf16.mxu1 %v571_v0  ;;  %463 = vmatpush3.bf16.msra.mxu0 %v495_v16 }
  0x32   :  { %464 = vmatprep.subr.bf16.mxu0 %v571_v0 }
  0x34   :  { %449 = vmatpush3.bf16.msra.mxu1 %v490_v11 }
  0x35   :  { %450 = vmatprep.subr.bf16.mxu1 %v571_v0  ;;  %465 = vmatpush3.bf16.msra.mxu0 %v496_v17 }
  0x36   :  { %466 = vmatprep.subr.bf16.mxu0 %v571_v0 }
  0x38   :  { %451 = vmatpush3.bf16.msra.mxu1 %v491_v12 }
  0x39   :  { %452 = vmatprep.subr.bf16.mxu1 %v571_v0  ;;  %467 = vmatpush3.bf16.msra.mxu0 %v497_v18 }
  0x3a   :  { %468 = vmatprep.subr.bf16.mxu0 %v571_v0 }
  0x3c   :  { %453 = vmatpush3.bf16.msra.mxu1 %v492_v13 }
  0x3d   :  { %469 = vmatpush3.bf16.msra.mxu0 %v498_v19 }
  0x3e   :  { %470 = vmatprep.subr.bf16.mxu0 %v571_v0 }
  0x41   :  { %471 = vmatpush3.bf16.msra.mxu0 %v499_v26 }
  0x42   :  { %472 = vmatprep.subr.bf16.mxu0 %v571_v0 }
  0x45   :  { %473 = vmatpush3.bf16.msra.mxu0 %v500_v27 }
  0xe7   :  { %v136_v21 = vpop.f32.mrf.mxu0 }
  0xe8   :  { %v137_v22 = vadd.f32 %v384_v20, %v136_v21 }
  0xe9   :  { %v437_v23 = vpop.f32.mrf.mxu0 }
  0xea   :  { %v140_v24 = vmax.f32 %v137_v22, 0.0 }
  0xec   :  { %v141_v25 = vpack.c.bf16 %v140_v24, %v140_v24 }
  0xee   :  { %455 = vmatmul.mubr.bf16.vlgmr.msra.gmra.mxu1 %v141_v25 }
 0x1ae   :  { %v247_v29 = vpop.f32.mrf.mxu1 }
 0x1af   :  { %v248_v30 = vadd.f32 %v386_v28, %v247_v29 }
 0x1b0   :  { %v456_v31 = vpop.f32.mrf.mxu1 }
 0x1b1   :  { %v253_v32 = vmax.f32 %v248_v30, 0.0 }
 0x1b2   :  { %v250_v33 = vpop.f32.mrf.mxu1 }
 0x1b3   :  { %v254_v34 = vpack.c.bf16 %v253_v32, %v253_v32 }
 0x1b4   :  { %v457_v35 = vpop.f32.mrf.mxu1 }
 0x1b5   :  { %475 = vmatmul.mubr.bf16.vlgmr.msra.gmra.mxu0 %v254_v34 }
 0x275   :  { %v360_v37 = vpop.f32.mrf.mxu0 }
 0x276   :  { %v361_v38 = vadd.f32 %v395_v36, %v360_v37 }
 0x277   :  { %v476_v39 = vpop.f32.mrf.mxu0 }
 0x278   :  { %367 = vst.msk [vmem:[#allocation7] sm:$0xff] %vm366_vm2, %v361_v38 }
 0x279   :  { %v363_v40 = vpop.f32.mrf.mxu0 }
 0x27a   :  { %552 = shalt.err (!%p549_p0)
}
 0x27b   :  { %377 = dma.vmem_to_hbm [thread:$0]  %s375_s22, 128, %s713_s7, [#allocation4]   ;;  %v477_v41 = vpop.f32.mrf.mxu0 }
 0x27c   :  { %565 = dma.done.wait [#allocation4], 128  }
 0x27d   :  { %566 = vsyncadd [#allocation4], 4294967168 }
 0x27e   :  { %381 = vsyncpa [#allocation3], 1 }
 0x27f   :  { %382 = vsyncpa [#allocation6], 1 }
 0x280   :  { %383 = vsyncpa [#allocation4], 1 }

</bundles_post_ra>
